<compile_context>
chip_gen: v7x
topology: tpu7x:2x2x1
jax: 0.10.0
libtpu: 0.0.40
codegen_flags: <defaults>
</compile_context>

<pallas_src>
import functools

import jax
import jax.numpy as jnp
from jax.experimental import pallas as pl
from jax.experimental.pallas import tpu as pltpu

IN_FTS = 728
HID_FTS = 512
OUT_FTS = 256


def _round_up(x, m):
    return (x + m - 1) // m * m


def _mlp_kernel(x_ref, w1_ref, b1_ref, w2_ref, b2_ref, o_ref):
    # x_ref : (bm, 728)  f32 or bf16      w1_ref: (728, 512) bf16
    # b1_ref: (1, 512)   f32              w2_ref: (512, 256) bf16
    # b2_ref: (1, 256)   f32              o_ref : (bm, 256)  out dtype
    xb = x_ref[...].astype(jnp.bfloat16)          # no-op if x is already bf16
    # K = 728 contraction: Mosaic pads/masks to MXU granularity internally,
    # so no activation padding is needed anywhere.
    h = jnp.dot(xb, w1_ref[...], preferred_element_type=jnp.float32)
    h = jnp.maximum(h + b1_ref[...], 0.0)         # bias + ReLU in f32 (VPU)
    out = jnp.dot(h.astype(jnp.bfloat16), w2_ref[...],
                  preferred_element_type=jnp.float32)
    o_ref[...] = (out + b2_ref[...]).astype(o_ref.dtype)


def prepare_params(w1, b1, w2, b2):
    """One-time (model-load) conversion to kernel layout/dtypes.

    Expects x @ W + b layout: w1 (728, 512), w2 (512, 256).  (PyTorch
    nn.Linear stores (out, in); transpose once before calling this.)
    Hoisted out of the per-call hot path so weights are not re-cast per call.
    """
    return (w1.astype(jnp.bfloat16),
            jnp.reshape(b1, (1, HID_FTS)).astype(jnp.float32),
            w2.astype(jnp.bfloat16),
            jnp.reshape(b2, (1, OUT_FTS)).astype(jnp.float32))


@functools.partial(jax.jit, static_argnames=("block_batch", "out_dtype"))
def finetune_encoder_language(x, w1, b1, w2, b2, *, block_batch=512,
                              out_dtype=None):
    """x: (B, 728) f32 or bf16; w1: (728,512) bf16; b1: (1,512) f32;
    w2: (512,256) bf16; b2: (1,256) f32 (use prepare_params for the weights)."""
    B, F = x.shape
    assert F == IN_FTS
    assert w1.shape == (IN_FTS, HID_FTS) and w2.shape == (HID_FTS, OUT_FTS)
    out_dtype = x.dtype if out_dtype is None else jnp.dtype(out_dtype)

    # Batch tile: multiple of 8 (f32 sublane), clamped for tiny B, and capped
    # so the grid has >= 2 steps whenever possible (lets the "parallel" axis
    # shard across the 2 TensorCores on v7x; harmless on v5e/v6e).
    bm = min(block_batch, _round_up(B, 8))
    if B > 8:
        bm = min(bm, _round_up(pl.cdiv(B, 2), 8))
    grid = (pl.cdiv(B, bm),)

    cost = pl.CostEstimate(
        flops=2 * B * (IN_FTS * HID_FTS + HID_FTS * OUT_FTS),
        transcendentals=0,
        bytes_accessed=(B * IN_FTS * x.dtype.itemsize
                        + B * OUT_FTS * out_dtype.itemsize
                        + IN_FTS * HID_FTS * 2 + HID_FTS * OUT_FTS * 2
                        + (HID_FTS + OUT_FTS) * 4),
    )

    resident = pl.Buffered(1)   # constant index_map -> single-buffer, save VMEM
    return pl.pallas_call(
        _mlp_kernel,
        out_shape=jax.ShapeDtypeStruct((B, OUT_FTS), out_dtype),
        grid_spec=pltpu.PrefetchScalarGridSpec(
            num_scalar_prefetch=0,
            grid=grid,
            in_specs=[
                pl.BlockSpec((bm, IN_FTS), lambda i: (i, 0)),   # x tile (pipelined)
                pl.BlockSpec((IN_FTS, HID_FTS), lambda i: (0, 0),
                             pipeline_mode=resident),           # W1 (resident)
                pl.BlockSpec((1, HID_FTS), lambda i: (0, 0),
                             pipeline_mode=resident),           # b1
                pl.BlockSpec((HID_FTS, OUT_FTS), lambda i: (0, 0),
                             pipeline_mode=resident),           # W2 (resident)
                pl.BlockSpec((1, OUT_FTS), lambda i: (0, 0),
                             pipeline_mode=resident),           # b2
            ],
            out_specs=pl.BlockSpec((bm, OUT_FTS), lambda i: (i, 0)),
        ),
        compiler_params=pltpu.CompilerParams(
            dimension_semantics=("parallel",)),
        cost_estimate=cost,
    )(x, w1, b1, w2, b2)


def _reference(x, w1, b1, w2, b2):
    # Same bf16-operand / f32-accumulate math as the kernel, in plain XLA.
    h = jnp.dot(x.astype(jnp.bfloat16), w1.astype(jnp.bfloat16),
                preferred_element_type=jnp.float32) + b1.reshape(1, -1)
    h = jnp.maximum(h, 0.0)
    return jnp.dot(h.astype(jnp.bfloat16), w2.astype(jnp.bfloat16),
                   preferred_element_type=jnp.float32) + b2.reshape(1, -1)


if __name__ == "__main__":
    key = jax.random.PRNGKey(0)
    kx, k1, kb1, k2, kb2 = jax.random.split(key, 5)

    batch = 16  # small example batch
    x = jax.random.normal(kx, (batch, IN_FTS), dtype=jnp.float32)

    # Deterministic "PyTorch-like" init (uniform in +/- 1/sqrt(fan_in)),
    # stored pre-transposed as (in, out).
    lim1 = 1.0 / jnp.sqrt(jnp.float32(IN_FTS))
    w1 = jax.random.uniform(k1, (IN_FTS, HID_FTS), jnp.float32, -lim1, lim1)
    b1 = jax.random.uniform(kb1, (HID_FTS,), jnp.float32, -lim1, lim1)
    lim2 = 1.0 / jnp.sqrt(jnp.float32(HID_FTS))
    w2 = jax.random.uniform(k2, (HID_FTS, OUT_FTS), jnp.float32, -lim2, lim2)
    b2 = jax.random.uniform(kb2, (OUT_FTS,), jnp.float32, -lim2, lim2)

    # One-time parameter prep (bf16 weights, (1, N) f32 biases).
    w1_k, b1_k, w2_k, b2_k = prepare_params(w1, b1, w2, b2)

    out = finetune_encoder_language(x, w1_k, b1_k, w2_k, b2_k)
    out = jax.block_until_ready(out)

    ref = _reference(x, w1, b1, w2, b2)
    assert out.shape == (batch, OUT_FTS)
    assert jnp.allclose(out, ref, atol=2e-2, rtol=2e-2), "mismatch vs reference"

    print("KERNEL_OK")
</pallas_src>

<mosaic_0001>
module attributes {stable_mosaic.version = 11 : i64} {
  func.func @_mlp_kernel(%arg0: i32, %arg1: memref<8x728xf32, #tpu.memory_space<vmem>>, %arg2: memref<728x512xbf16, #tpu.memory_space<vmem>>, %arg3: memref<1x512xf32, #tpu.memory_space<vmem>>, %arg4: memref<512x256xbf16, #tpu.memory_space<vmem>>, %arg5: memref<1x256xf32, #tpu.memory_space<vmem>>, %arg6: memref<8x256xf32, #tpu.memory_space<vmem>>) attributes {dimension_semantics = [#tpu.dimension_semantics<parallel>], iteration_bounds = array<i64: 2>, scalar_prefetch = 0 : i64, scratch_operands = 0 : i64, tpu.core_type = #tpu.core_type<tc>, window_params = [{transform_indices = @transform_0, window_bounds = array<i64: 8, 728>}, {pipeline_mode = #tpu.pipeline_mode<synchronous>, transform_indices = @transform_1, window_bounds = array<i64: 728, 512>}, {pipeline_mode = #tpu.pipeline_mode<synchronous>, transform_indices = @transform_2, window_bounds = array<i64: 1, 512>}, {pipeline_mode = #tpu.pipeline_mode<synchronous>, transform_indices = @transform_3, window_bounds = array<i64: 512, 256>}, {pipeline_mode = #tpu.pipeline_mode<synchronous>, transform_indices = @transform_4, window_bounds = array<i64: 1, 256>}, {transform_indices = @transform_5, window_bounds = array<i64: 8, 256>}]} {
    %c0 = arith.constant 0 : index
    %c0_0 = arith.constant 0 : index
    %0 = vector.load %arg1[%c0, %c0_0] : memref<8x728xf32, #tpu.memory_space<vmem>>, vector<8x728xf32>
    %1 = arith.truncf %0 : vector<8x728xf32> to vector<8x728xbf16>
    %c0_1 = arith.constant 0 : index
    %c0_2 = arith.constant 0 : index
    %2 = vector.load %arg2[%c0_1, %c0_2] : memref<728x512xbf16, #tpu.memory_space<vmem>>, vector<728x512xbf16>
    %cst = arith.constant dense<0.000000e+00> : vector<8x512xf32>
    %3 = tpu.matmul %1, %2, %cst {dimension_numbers = #tpu.dot_dimension_numbers<[1], [0], [0], [1], [0, 0, 1, 1], [], []>} : vector<8x728xbf16>, vector<728x512xbf16>, vector<8x512xf32> -> vector<8x512xf32>
    %c0_3 = arith.constant 0 : index
    %c0_4 = arith.constant 0 : index
    %4 = vector.load %arg3[%c0_3, %c0_4] : memref<1x512xf32, #tpu.memory_space<vmem>>, vector<1x512xf32>
    %5 = vector.broadcast %4 : vector<1x512xf32> to vector<8x512xf32>
    %6 = arith.addf %3, %5 : vector<8x512xf32>
    %cst_5 = arith.constant 0.000000e+00 : f32
    %7 = vector.broadcast %cst_5 : f32 to vector<8x512xf32>
    %8 = arith.maximumf %6, %7 : vector<8x512xf32>
    %9 = arith.truncf %8 : vector<8x512xf32> to vector<8x512xbf16>
    %c0_6 = arith.constant 0 : index
    %c0_7 = arith.constant 0 : index
    %10 = vector.load %arg4[%c0_6, %c0_7] : memref<512x256xbf16, #tpu.memory_space<vmem>>, vector<512x256xbf16>
    %cst_8 = arith.constant dense<0.000000e+00> : vector<8x256xf32>
    %11 = tpu.matmul %9, %10, %cst_8 {dimension_numbers = #tpu.dot_dimension_numbers<[1], [0], [0], [1], [0, 0, 1, 1], [], []>} : vector<8x512xbf16>, vector<512x256xbf16>, vector<8x256xf32> -> vector<8x256xf32>
    %c0_9 = arith.constant 0 : index
    %c0_10 = arith.constant 0 : index
    %12 = vector.load %arg5[%c0_9, %c0_10] : memref<1x256xf32, #tpu.memory_space<vmem>>, vector<1x256xf32>
    %13 = vector.broadcast %12 : vector<1x256xf32> to vector<8x256xf32>
    %14 = arith.addf %11, %13 : vector<8x256xf32>
    %c0_11 = arith.constant 0 : index
    %c0_12 = arith.constant 0 : index
    %15 = vector.load %arg6[%c0_11, %c0_12] : memref<8x256xf32, #tpu.memory_space<vmem>>, vector<8x256xf32>
    tpu.vector_store %arg6[%c0_11, %c0_12], %14 {strides = array<i32>} : memref<8x256xf32, #tpu.memory_space<vmem>>, vector<8x256xf32>,
    return
  }
  func.func @transform_0(%arg0: i32) -> (i32, i32) {
    %c0_i32 = arith.constant 0 : i32
    %c0_i32_0 = arith.constant 0 : i32
    return %arg0, %c0_i32 : i32, i32
  }
  func.func @transform_1(%arg0: i32) -> (i32, i32) {
    %c0_i32 = arith.constant 0 : i32
    %c0_i32_0 = arith.constant 0 : i32
    %c0_i32_1 = arith.constant 0 : i32
    return %c0_i32, %c0_i32_0 : i32, i32
  }
  func.func @transform_2(%arg0: i32) -> (i32, i32) {
    %c0_i32 = arith.constant 0 : i32
    %c0_i32_0 = arith.constant 0 : i32
    %c0_i32_1 = arith.constant 0 : i32
    return %c0_i32, %c0_i32_0 : i32, i32
  }
  func.func @transform_3(%arg0: i32) -> (i32, i32) {
    %c0_i32 = arith.constant 0 : i32
    %c0_i32_0 = arith.constant 0 : i32
    %c0_i32_1 = arith.constant 0 : i32
    return %c0_i32, %c0_i32_0 : i32, i32
  }
  func.func @transform_4(%arg0: i32) -> (i32, i32) {
    %c0_i32 = arith.constant 0 : i32
    %c0_i32_0 = arith.constant 0 : i32
    %c0_i32_1 = arith.constant 0 : i32
    return %c0_i32, %c0_i32_0 : i32, i32
  }
  func.func @transform_5(%arg0: i32) -> (i32, i32) {
    %c0_i32 = arith.constant 0 : i32
    %c0_i32_0 = arith.constant 0 : i32
    return %arg0, %c0_i32 : i32, i32
  }
}

</mosaic_0001>

<bundles_post_ra>
// kernel: finetune_encoder_language.1
= control target key start
LH: loop header
LB: loop body
LE: loop exit
PB: predicated region body
PF: predicated region fallthrough
CT: control target
= control target key end

     0   :  { %10 = vsyncpa [#allocation3], 0  ;;  %s3478_s0 = inlined_call_operand.hbm [shape: f32[16,728], index: 0, kind: input, shape index: {}]   ;;  %s3479_s1 = inlined_call_operand.hbm [shape: bf16[728,512], index: 1, kind: input, shape index: {}]   ;;  %s3480_s2 = inlined_call_operand.vmem [shape: f32[1,512], index: 2, kind: input, shape index: {}]   ;;  %s3481_s3 = inlined_call_operand.hbm [shape: bf16[512,256], index: 3, kind: input, shape index: {}]   ;;  %s3482_s4 = inlined_call_operand.vmem [shape: f32[1,256], index: 4, kind: input, shape index: {}]   ;;  %s3483_s5 = inlined_call_operand.hbm [shape: f32[16,256], index: 5, kind: output, shape index: {}]  }
   0x1   :  { %12 = vsyncpa [#allocation3 + $0x1], 0 }
   0x2   :  { %13 = vsyncpa [#allocation6], 0 }
   0x3   :  { %14 = vsyncpa [#allocation4], 0 }
   0x4   :  { %16 = vsyncpa [#allocation4 + $0x1], 0  ;;  %s3184_s18 = smov 0   ;;  %s3186_s19 = smov 0  }
   0x5   :  { %s3188_s20 = smov 0   ;;  %s3190_s21 = smov 0  }
   0x6 LB: > { %s3205_s22 = sadd.s32 4294967295, %s3144_s21   ;;  %s2252_s23 = sadd.s32 4294967294, %s3144_s21   ;;  %s3144_s21 = sphi %s3190_s21, %s3503_s21   ;;  %s3140_s20 = sphi %s3188_s20, %s3502_s20   ;;  %s3136_s19 = sphi %s3186_s19, %s3501_s19   ;;  %s3132_s18 = sphi %s3184_s18, %s3500_s18  }
   0x7   : > { %p42_p0 = scmp.ne.s32.totalorder %s3136_s19, %s3132_s18  ;;  %p3484_p1 = scmp.eq.s32.totalorder %s3205_s22, 0 }
   0x8   : > { %p156_p3 = scmp.eq.s32.totalorder %s2252_s23, 1  ;;  %p2253_p5 = scmp.ge.s32.totalorder %s3144_s21, 1 }
   0x9   : > { %p3214_p4 = por %p3484_p1, %p42_p0  ;;  %p163_p7 = scmp.lt.s32.totalorder %s3144_s21, 3 }
   0xa   : > { %p3219_p6 = por %p156_p3, %p42_p0  ;;  %s3146_s27 = smov [#allocation5]  }
   0xb   : > { %s3487_s24 = scalar_select %p3214_p4, 1, 0 }
   0xc   : > { %s3488_s25 = scalar_select %p3219_p6, 1, 0 }
   0xd   : > { %p3224_p8 = pnand %p2253_p5, %p163_p7  ;;  %s175_s28 = sshll.u32 %s3146_s27, 4  ;;  %s3228_s28 = int_to_ptr.vmem [resolvable:$true] %s175_s28 }
   0xe   : > { %s3147_s30 = smov [#allocation7]   ;;  %s2988_s9 = scalar_lea.hbm %s3479_s1, 23296 }
   0xf   : > { %p2559_p9 = pneg %p3224_p8  ;;  %s191_s6 = sshll.u32 %s3147_s30, 4  ;;  %s3239_s6 = int_to_ptr.vmem [resolvable:$true] %s191_s6 }
  0x10   : > { %p2989_p12 = scmp.ne.s32.totalorder %s3479_s1, %s2988_s9  ;;  %p2995_p5 = scmp.lt.u32.totalorder %s2988_s9, %s3479_s1 }
  0x11   : > { %p3235_p11 = pnand %p2559_p9, %p3484_p1 }
  0x13   : > { %p2990_p13 = pneg %p3235_p11 }
  0x15   : > { %p2991_p0 = pnand %p2990_p13, %p2989_p12 }
  0x17   : > { %p2992_p3 = pneg %p2991_p0 }
  0x19   : > { %p2997_p7 = pnand %p2995_p5, %p2992_p3 }
  0x1b   : > { %3000 = shalt.err (!%p2997_p7)
}
  0x1c   : > { %s3001_s14 = scalar_lea.vmem %s3228_s28, 23296  ;;  %p3009_p2 = scmp.lt.s32.totalorder %s3228_s28, %s3228_s28 }
  0x1d   : > { %p3002_p9 = scmp.ne.s32.totalorder %s3228_s28, %s3001_s14  ;;  %p3010_p12 = scmp.lt.s32.totalorder %s3001_s14, %s3001_s14 }
  0x1f   : > { %p3004_p10 = pnand %p3002_p9, %p2990_p13  ;;  %p3011_p0 = por %p3010_p12, %p3009_p2 }
  0x21   : > { %p3005_p1 = pneg %p3004_p10 }
  0x23   : > { %p3012_p6 = pnand %p3011_p0, %p3005_p1 }
  0x25   : > { %3015 = shalt.err (!%p3012_p6)
}
  0x26   : > { %s3148_s15 = smov 256   ;;  %s3149_s16 = smov 16  }
  0x27   : > { %2562 = dma.hbm_to_vmem [thread:$0]  (!%p3235_p11), %s3479_s1, 23296, %s3228_s28, [#allocation6], %s3148_s15, %s3148_s15, %s3149_s16  }
  0x28   : > { %s3016_s7 = scalar_lea.hbm %s3481_s3, 8192 }
  0x29   : > { %p3017_p2 = scmp.ne.s32.totalorder %s3481_s3, %s3016_s7  ;;  %p3023_p10 = scmp.lt.u32.totalorder %s3016_s7, %s3481_s3 }
  0x2b   : > { %p3019_p1 = pnand %p3017_p2, %p2990_p13 }
  0x2d   : > { %p3020_p6 = pneg %p3019_p1 }
  0x2f   : > { %p3025_p3 = pnand %p3023_p10, %p3020_p6 }
  0x31   : > { %3028 = shalt.err (!%p3025_p3)
}
  0x32   : > { %s3029_s28 = scalar_lea.vmem %s3239_s6, 8192  ;;  %p3037_p12 = scmp.lt.s32.totalorder %s3239_s6, %s3239_s6 }
  0x33   : > { %p3030_p5 = scmp.ne.s32.totalorder %s3239_s6, %s3029_s28  ;;  %p3038_p0 = scmp.lt.s32.totalorder %s3029_s28, %s3029_s28 }
  0x35   : > { %p3032_p7 = pnand %p3030_p5, %p2990_p13  ;;  %p3039_p2 = por %p3038_p0, %p3037_p12 }
  0x37   : > { %p3033_p9 = pneg %p3032_p7 }
  0x39   : > { %p3040_p1 = pnand %p3039_p2, %p3033_p9 }
  0x3b   : > { %3043 = shalt.err (!%p3040_p1)
}
  0x3c   : > { %s3150_s12 = smov 128   ;;  %s3151_s13 = smov 8  }
  0x3d   : > { %2565 = dma.hbm_to_vmem [thread:$0]  (!%p3235_p11), %s3481_s3, 8192, %s3239_s6, [#allocation6], %s3150_s12, %s3150_s12, %s3151_s13  }
  0x3e   : > { %s3294_s16 = sadd.s32 1, %s3144_s21   ;;  %s29_s23 = sadd.s32 1, %s3140_s20 }
  0x3f   : > { %s26_s17 = ssub.s32 %s3144_s21, %s3294_s16  ;;  %p36_p6 = scmp.ne.s32.totalorder %s3140_s20, %s3136_s19 }
  0x40   : > { %p27_p13 = scmp.eq.s32.totalorder %s26_s17, 0  ;;  %p37_p10 = scmp.eq.s32.totalorder %s3144_s21, 0 }
  0x41   : > { %p3491_p5 = scmp.eq.s32.totalorder %s3205_s22, 1  ;;  %p2576_p9 = scmp.lt.s32.totalorder %s3144_s21, 2 }
  0x42   : > { %s3303_s27 = scalar_select %p27_p13, %s3140_s20, %s29_s23  }
  0x43   : > { %p38_p3 = por %p37_p10, %p36_p6  ;;  %p3307_p7 = por %p3491_p5, %p36_p6 }
  0x44   : > { %s208_s29 = sand.u32 1, %s3140_s20   ;;  %s2545_s6 = smul.u32 768, %s3144_s21 }
  0x45   : > { %s3492_s30 = scalar_select %p3307_p7, 1, 0 }
  0x46   : > { %s2544_s7 = smul.u32 48, %s208_s29  ;;  %p3314_p11 = pnand %p2576_p9, %p38_p3 }
  0x47   : > { %s3321_s11 = scalar_lea.hbm %s3478_s0, %s2545_s6  ;;  %s209_s13 = scalar_lea.sflag [#allocation3], %s208_s29 }
  0x48   : > { %s212_s28 = scalar_lea.vmem [#allocation2], %s2544_s7  ;;  %s3044_s14 = scalar_lea.hbm %s3321_s11, 768 }
  0x49   : > { %s220_s12 = sshll.u32 %s212_s28, 4  ;;  %p3045_p12 = scmp.ne.s32.totalorder %s3321_s11, %s3044_s14  ;;  %s3323_s12 = int_to_ptr.vmem [resolvable:$true] %s220_s12 }
  0x4a   : > { %p3046_p0 = pneg %p3314_p11  ;;  %s3049_s23 = scalar_lea.hbm %s3478_s0, 1536 }
  0x4b   : > { %p3050_p13 = scmp.lt.u32.totalorder %s3321_s11, %s3478_s0  ;;  %p3051_p6 = scmp.lt.u32.totalorder %s3049_s23, %s3044_s14 }
  0x4c   : > { %p3047_p2 = pnand %p3046_p0, %p3045_p12  ;;  %p3053_p3 = scmp.lt.u32.totalorder %s3044_s14, %s3321_s11 }
  0x4d   : > { %p3052_p10 = por %p3051_p6, %p3050_p13 }
  0x4e   : > { %p3048_p1 = pneg %p3047_p2 }
  0x4f   : > { %p3054_p5 = por %p3053_p3, %p3052_p10 }
  0x51   : > { %p3055_p9 = pnand %p3054_p5, %p3048_p1 }
  0x53   : > { %3058 = shalt.err (!%p3055_p9)
}
  0x54   : > { %s3059_s29 = scalar_lea.vmem %s3323_s12, 768  ;;  %s3152_s7 = smov [#allocation2]  }
  0x55   : > { %p3060_p12 = scmp.ne.s32.totalorder %s3323_s12, %s3059_s29  ;;  %s3064_s10 = sshll.u32 %s3152_s7, 4  ;;  %s3065_s10 = int_to_ptr.vmem [resolvable:$false] %s3064_s10 }
  0x56   : > { %s3066_s28 = scalar_lea.vmem %s3065_s10, 1536  ;;  %p3067_p4 = scmp.lt.s32.totalorder %s3323_s12, %s3065_s10 }
  0x57   : > { %p3062_p2 = pnand %p3060_p12, %p3046_p0  ;;  %p3068_p13 = scmp.lt.s32.totalorder %s3066_s28, %s3059_s29 }
  0x59   : > { %p3063_p7 = pneg %p3062_p2  ;;  %p3069_p6 = por %p3068_p13, %p3067_p4 }
  0x5b   : > { %p3070_p10 = pnand %p3069_p6, %p3063_p7 }
  0x5d   : > { %3073 = shalt.err (!%p3070_p10)
}
  0x5e   : > { %2569 = dma.hbm_to_vmem [thread:$0]  (!%p3314_p11), %s3321_s11, 768, %s3323_s12, %s209_s13  }
  0x5f   : > { %229 = sbr.rel (%p3224_p8) target bundleno = 804 (0x324), region = 40  ;;  %s3353_s14 = sand.u32 (!%p3224_p8), 1, %s3136_s19  }
  0x60   : > { %s2546_s15 = smul.u32 (!%p3224_p8), 48, %s3353_s14  ;;  %s232_s17 = scalar_lea.sflag (!%p3224_p8), [#allocation3], %s3353_s14 }
  0x61   : > { %p3494_p4 = scmp.ne.s32.totalorder (!%p3224_p8), %s3487_s24, 0 }
  0x62   : > { %s3357_s23 = scalar_lea.vmem (!%p3224_p8), [#allocation2], %s2546_s15 }
  0x66   : > { %3119 = dma.done.wait (%p3494_p4), %s232_s17, 768  }
  0x67   : > { %3121 = vsyncadd (%p3494_p4), %s232_s17, 4294966528  ;;  %p3495_p7 = scmp.eq.s32.totalorder %s3205_s22, 0 }
  0x69   : > { %3123 = dma.done.wait (%p3495_p7), [#allocation6], 31488   ;;  %p3496_p8 = pmov %p3495_p7 }
  0x6a   : > { %v2618_v0 = vld [vmem:[#allocation5 + $0x4] ss:$16 sps:$4 sm:$0xff]   ;;  %v2622_v2 = vld [vmem:[#allocation5] ss:$16 sps:$4 sm:$0xff]   ;;  %v272_v46 = vld [vmem:[%s3357_s23 + $0x8] sm:$0xff]  ;;  %vm1397_vm0 = vcmask 719872  }
  0x6b   : > { %3125 = vsyncadd (%p3496_p8), [#allocation6], 4294935808  ;;  %v2620_v1 = vld [vmem:[#allocation5 + $0x204] ss:$16 sps:$4 sm:$0xff]   ;;  %1414 = vmatprep.subr.bf16.mxu1 %v2618_v0  ;;  %v2623_v3 = vld [vmem:[#allocation5 + $0x200] ss:$16 sps:$4 sm:$0xff]   ;;  %v3368_v48 = vpack.c.bf16 %v272_v46, %v272_v46 }
  0x6c   : > { %1455 = vmatprep.subr.bf16.mxu0 %v2620_v1  ;;  %v2624_v4 = vld [vmem:[#allocation5 + $0x24] ss:$16 sps:$4 sm:$0xff]   ;;  %1415 = vmatpush1.bf16.msra.mxu1 %v2622_v2  ;;  %v2628_v6 = vld [vmem:[#allocation5 + $0x20] ss:$16 sps:$4 sm:$0xff]   ;;  %v274_v49 = vld [vmem:[%s3357_s23 + $0x18] sm:$0xff]  ;;  %vm1401_vm1 = vcmask 1043456  }
  0x6d   : > { %1456 = vmatpush1.bf16.msra.mxu0 %v2623_v3  ;;  %v2626_v5 = vld [vmem:[#allocation5 + $0x224] ss:$16 sps:$4 sm:$0xff]   ;;  %1416 = vmatprep.subr.bf16.mxu1 %v2624_v4  ;;  %v2629_v7 = vld [vmem:[#allocation5 + $0x220] ss:$16 sps:$4 sm:$0xff]   ;;  %v3371_v52 = vpack.c.bf16 %v274_v49, %v274_v49  ;;  %v2771_v49 = vld [vmem:[#allocation5 + $0x128] ss:$16 sps:$4 sm:$0xff]  }
  0x6e   : > { %1457 = vmatprep.subr.bf16.mxu0 %v2626_v5  ;;  %v2630_v8 = vld [vmem:[#allocation5 + $0x44] ss:$16 sps:$4 sm:$0xff]   ;;  %v2634_v10 = vld [vmem:[#allocation5 + $0x40] ss:$16 sps:$4 sm:$0xff]   ;;  %1446 = vmatprep.mubr.bf16.mxu1 %v3368_v48  ;;  %s2261_s8 = sshll.u32 %s3353_s14, 4  ;;  %s2519_s13 = sshll.u32 %s3205_s22, 8 }
  0x6f   : > { %v2632_v9 = vld [vmem:[#allocation5 + $0x244] ss:$16 sps:$4 sm:$0xff]   ;;  %v2635_v11 = vld [vmem:[#allocation5 + $0x240] ss:$16 sps:$4 sm:$0xff]   ;;  %1487 = vmatprep.mubr.bf16.mxu0 %v3371_v52  ;;  %s269_s6 = scalar_lea.vmem [#allocation8], %s2261_s8  ;;  %s3434_s10 = scalar_lea.hbm %s3483_s5, %s2519_s13 }
  0x70   : > { %1417 = vmatpush1.bf16.msra.mxu1 %v2628_v6  ;;  %v2636_v12 = vld [vmem:[#allocation5 + $0x64] ss:$16 sps:$4 sm:$0xff]   ;;  %v2640_v14 = vld [vmem:[#allocation5 + $0x60] ss:$16 sps:$4 sm:$0xff]   ;;  %s2163_s9 = sshll.u32 %s269_s6, 4  ;;  %s2149_s22 = scalar_lea.sflag [#allocation4], %s3353_s14  ;;  %s3436_s9 = int_to_ptr.vmem [resolvable:$true] %s2163_s9 }
  0x71   : > { %1458 = vmatpush1.bf16.msra.mxu0 %v2629_v7  ;;  %1418 = vmatprep.subr.bf16.mxu1 %v2630_v8  ;;  %v2638_v13 = vld [vmem:[#allocation5 + $0x264] ss:$16 sps:$4 sm:$0xff]   ;;  %v2641_v15 = vld [vmem:[#allocation5 + $0x260] ss:$16 sps:$4 sm:$0xff]   ;;  %v2719_v7 = vld [vmem:[#allocation5 + $0xc] ss:$16 sps:$4 sm:$0xff]  }
  0x72   : > { %1459 = vmatprep.subr.bf16.mxu0 %v2632_v9  ;;  %v2642_v16 = vld [vmem:[#allocation5 + $0x84] ss:$16 sps:$4 sm:$0xff]   ;;  %v2646_v18 = vld [vmem:[#allocation5 + $0x80] ss:$16 sps:$4 sm:$0xff]   ;;  %s3074_s28 = scalar_lea.vmem %s3436_s9, 256  ;;  %p3497_p0 = scmp.ne.s32.totalorder %s3492_s30, 0 }
  0x73   : > { %v2644_v17 = vld [vmem:[#allocation5 + $0x284] ss:$16 sps:$4 sm:$0xff]   ;;  %v2647_v19 = vld [vmem:[#allocation5 + $0x280] ss:$16 sps:$4 sm:$0xff]   ;;  %p3075_p11 = scmp.ne.s32.totalorder %s3436_s9, %s3074_s28  ;;  %s3153_s15 = smov [#allocation8]  }
  0x74   : > { %1419 = vmatpush1.bf16.msra.mxu1 %v2634_v10  ;;  %v2648_v20 = vld [vmem:[#allocation5 + $0xa4] ss:$16 sps:$4 sm:$0xff]   ;;  %v2652_v22 = vld [vmem:[#allocation5 + $0xa0] ss:$16 sps:$4 sm:$0xff]   ;;  %v2717_v10 = vld [vmem:[#allocation5 + $0x8] ss:$16 sps:$4 sm:$0xff]  }
  0x75   : > { %1460 = vmatpush1.bf16.msra.mxu0 %v2635_v11  ;;  %1420 = vmatprep.subr.bf16.mxu1 %v2636_v12  ;;  %v2650_v21 = vld [vmem:[#allocation5 + $0x2a4] ss:$16 sps:$4 sm:$0xff]   ;;  %v2653_v23 = vld [vmem:[#allocation5 + $0x2a0] ss:$16 sps:$4 sm:$0xff]   ;;  %p3076_p1 = pnand %p3075_p11, %p3497_p0  ;;  %s3078_s17 = sshll.u32 %s3153_s15, 4  ;;  %s3079_s17 = int_to_ptr.vmem [resolvable:$false] %s3078_s17 }
  0x76   : > { %1461 = vmatprep.subr.bf16.mxu0 %v2638_v13  ;;  %v2654_v24 = vld [vmem:[#allocation5 + $0xc4] ss:$16 sps:$4 sm:$0xff]   ;;  %v2658_v26 = vld [vmem:[#allocation5 + $0xc0] ss:$16 sps:$4 sm:$0xff]   ;;  %v2725_v13 = vld [vmem:[#allocation5 + $0x2c] ss:$16 sps:$4 sm:$0xff]   ;;  %p3081_p5 = scmp.lt.s32.totalorder %s3436_s9, %s3079_s17 }
  0x77   : > { %v2656_v25 = vld [vmem:[#allocation5 + $0x2c4] ss:$16 sps:$4 sm:$0xff]   ;;  %v2659_v27 = vld [vmem:[#allocation5 + $0x2c0] ss:$16 sps:$4 sm:$0xff]   ;;  %p3077_p3 = pneg %p3076_p1 }
  0x78   : > { %1421 = vmatpush1.bf16.msra.mxu1 %v2640_v14  ;;  %v2660_v28 = vld [vmem:[#allocation5 + $0xe4] ss:$16 sps:$4 sm:$0xff]   ;;  %v2664_v30 = vld [vmem:[#allocation5 + $0xe0] ss:$16 sps:$4 sm:$0xff]  }
  0x79   : > { %1462 = vmatpush1.bf16.msra.mxu0 %v2641_v15  ;;  %1422 = vmatprep.subr.bf16.mxu1 %v2642_v16  ;;  %v2662_v29 = vld [vmem:[#allocation5 + $0x2e4] ss:$16 sps:$4 sm:$0xff]   ;;  %v2665_v31 = vld [vmem:[#allocation5 + $0x2e0] ss:$16 sps:$4 sm:$0xff]   ;;  %v2723_v15 = vld [vmem:[#allocation5 + $0x28] ss:$16 sps:$4 sm:$0xff]  }
  0x7a   : > { %1463 = vmatprep.subr.bf16.mxu0 %v2644_v17  ;;  %v2666_v32 = vld [vmem:[#allocation5 + $0x104] ss:$16 sps:$4 sm:$0xff]   ;;  %v2670_v34 = vld [vmem:[#allocation5 + $0x100] ss:$16 sps:$4 sm:$0xff]   ;;  %v2731_v17 = vld [vmem:[#allocation5 + $0x4c] ss:$16 sps:$4 sm:$0xff]  }
  0x7b   : > { %v2668_v33 = vld [vmem:[#allocation5 + $0x304] ss:$16 sps:$4 sm:$0xff]   ;;  %v2671_v35 = vld [vmem:[#allocation5 + $0x300] ss:$16 sps:$4 sm:$0xff]  }
  0x7c   : > { %1423 = vmatpush1.bf16.msra.mxu1 %v2646_v18  ;;  %v2672_v36 = vld [vmem:[#allocation5 + $0x124] ss:$16 sps:$4 sm:$0xff]   ;;  %v2676_v38 = vld [vmem:[#allocation5 + $0x120] ss:$16 sps:$4 sm:$0xff]  }
  0x7d   : > { %1464 = vmatpush1.bf16.msra.mxu0 %v2647_v19  ;;  %1424 = vmatprep.subr.bf16.mxu1 %v2648_v20  ;;  %v2674_v37 = vld [vmem:[#allocation5 + $0x324] ss:$16 sps:$4 sm:$0xff]   ;;  %v2677_v39 = vld [vmem:[#allocation5 + $0x320] ss:$16 sps:$4 sm:$0xff]   ;;  %v2729_v19 = vld [vmem:[#allocation5 + $0x48] ss:$16 sps:$4 sm:$0xff]  }
  0x7e   : > { %1465 = vmatprep.subr.bf16.mxu0 %v2650_v21  ;;  %v2678_v40 = vld [vmem:[#allocation5 + $0x144] ss:$16 sps:$4 sm:$0xff]   ;;  %v2682_v42 = vld [vmem:[#allocation5 + $0x140] ss:$16 sps:$4 sm:$0xff]   ;;  %v2737_v21 = vld [vmem:[#allocation5 + $0x6c] ss:$16 sps:$4 sm:$0xff]  }
  0x7f   : > { %v2680_v41 = vld [vmem:[#allocation5 + $0x344] ss:$16 sps:$4 sm:$0xff]   ;;  %v2683_v43 = vld [vmem:[#allocation5 + $0x340] ss:$16 sps:$4 sm:$0xff]  }
  0x80   : > { %1425 = vmatpush1.bf16.msra.mxu1 %v2652_v22  ;;  %v2684_v44 = vld [vmem:[#allocation5 + $0x164] ss:$16 sps:$4 sm:$0xff]   ;;  %v2688_v47 = vld [vmem:[#allocation5 + $0x160] ss:$16 sps:$4 sm:$0xff]  }
  0x81   : > { %1466 = vmatpush1.bf16.msra.mxu0 %v2653_v23  ;;  %1426 = vmatprep.subr.bf16.mxu1 %v2654_v24  ;;  %v2686_v45 = vld [vmem:[#allocation5 + $0x364] ss:$16 sps:$4 sm:$0xff]   ;;  %v2689_v50 = vld [vmem:[#allocation5 + $0x360] ss:$16 sps:$4 sm:$0xff]   ;;  %v2735_v23 = vld [vmem:[#allocation5 + $0x68] ss:$16 sps:$4 sm:$0xff]  }
  0x82   : > { %1467 = vmatprep.subr.bf16.mxu0 %v2656_v25  ;;  %v2690_v51 = vld [vmem:[#allocation5 + $0x184] ss:$16 sps:$4 sm:$0xff]   ;;  %v2694_v54 = vld [vmem:[#allocation5 + $0x180] ss:$16 sps:$4 sm:$0xff]   ;;  %v2743_v25 = vld [vmem:[#allocation5 + $0x8c] ss:$16 sps:$4 sm:$0xff]  }
  0x83   : > { %v2692_v53 = vld [vmem:[#allocation5 + $0x384] ss:$16 sps:$4 sm:$0xff]   ;;  %v2695_v55 = vld [vmem:[#allocation5 + $0x380] ss:$16 sps:$4 sm:$0xff]  }
  0x84   : > { %1427 = vmatpush1.bf16.msra.mxu1 %v2658_v26  ;;  %v2696_v56 = vld [vmem:[#allocation5 + $0x1a4] ss:$16 sps:$4 sm:$0xff]   ;;  %v2700_v58 = vld [vmem:[#allocation5 + $0x1a0] ss:$16 sps:$4 sm:$0xff]  }
  0x85   : > { %1468 = vmatpush1.bf16.msra.mxu0 %v2659_v27  ;;  %1428 = vmatprep.subr.bf16.mxu1 %v2660_v28  ;;  %v2698_v57 = vld [vmem:[#allocation5 + $0x3a4] ss:$16 sps:$4 sm:$0xff]   ;;  %v2701_v59 = vld [vmem:[#allocation5 + $0x3a0] ss:$16 sps:$4 sm:$0xff]   ;;  %v2741_v27 = vld [vmem:[#allocation5 + $0x88] ss:$16 sps:$4 sm:$0xff]  }
  0x86   : > { %1469 = vmatprep.subr.bf16.mxu0 %v2662_v29  ;;  %v2702_v60 = vld [vmem:[#allocation5 + $0x1c4] ss:$16 sps:$4 sm:$0xff]   ;;  %v2706_v62 = vld [vmem:[#allocation5 + $0x1c0] ss:$16 sps:$4 sm:$0xff]   ;;  %v276_v29 = vld [vmem:[%s3357_s23 + $0x28] sm:$0xff] }
  0x87   : > { %v2704_v61 = vld [vmem:[#allocation5 + $0x3c4] ss:$16 sps:$4 sm:$0xff]   ;;  %v2707_v63 = vld [vmem:[#allocation5 + $0x3c0] ss:$16 sps:$4 sm:$0xff]  }
  0x88   : > { %1429 = vmatpush1.bf16.msra.mxu1 %v2664_v30  ;;  %v2708_v0 = vld [vmem:[#allocation5 + $0x1e4] ss:$16 sps:$4 sm:$0xff]   ;;  %v2712_v2 = vld [vmem:[#allocation5 + $0x1e0] ss:$16 sps:$4 sm:$0xff]   ;;  %v2749_v30 = vld [vmem:[#allocation5 + $0xac] ss:$16 sps:$4 sm:$0xff]  }
  0x89   : > { %1470 = vmatpush1.bf16.msra.mxu0 %v2665_v31  ;;  %1430 = vmatprep.subr.bf16.mxu1 %v2666_v32  ;;  %v2710_v1 = vld [vmem:[#allocation5 + $0x3e4] ss:$16 sps:$4 sm:$0xff]   ;;  %v2713_v3 = vld [vmem:[#allocation5 + $0x3e0] ss:$16 sps:$4 sm:$0xff]   ;;  %v3385_v31 = vpack.c.bf16 %v276_v29, %v276_v29 }
  0x8a   : > { %1471 = vmatprep.subr.bf16.mxu0 %v2668_v33  ;;  %v271_v4 = vld [vmem:[%s3357_s23] sm:$0xff]  ;;  %v273_v6 = vld [vmem:[%s3357_s23 + $0x10] sm:$0xff]  ;;  %v2747_v33 = vld [vmem:[#allocation5 + $0xa8] ss:$16 sps:$4 sm:$0xff]  }
  0x8b   : > { %v2716_v5 = vld [vmem:[#allocation5 + $0x404] ss:$16 sps:$4 sm:$0xff]   ;;  %v3377_v8 = vpack.c.bf16 %v271_v4, %v271_v4  ;;  %v2714_v9 = vld [vmem:[#allocation5 + $0x400] ss:$16 sps:$4 sm:$0xff]   ;;  %v3379_v11 = vpack.c.bf16 %v273_v6, %v273_v6  ;;  %v2799_v6 = vld [vmem:[#allocation5 + $0x1cc] ss:$16 sps:$4 sm:$0xff]  }
  0x8c   : > { %1431 = vmatpush1.bf16.msra.mxu1 %v2670_v34  ;;  %v2722_v12 = vld [vmem:[#allocation5 + $0x424] ss:$16 sps:$4 sm:$0xff]   ;;  %v2720_v14 = vld [vmem:[#allocation5 + $0x420] ss:$16 sps:$4 sm:$0xff]  }
  0x8d   : > { %1472 = vmatpush1.bf16.msra.mxu0 %v2671_v35  ;;  %1432 = vmatprep.subr.bf16.mxu1 %v2672_v36  ;;  %v2728_v16 = vld [vmem:[#allocation5 + $0x444] ss:$16 sps:$4 sm:$0xff]   ;;  %v2726_v18 = vld [vmem:[#allocation5 + $0x440] ss:$16 sps:$4 sm:$0xff]   ;;  %v2755_v35 = vld [vmem:[#allocation5 + $0xcc] ss:$16 sps:$4 sm:$0xff]  }
  0x8e   : > { %1473 = vmatprep.subr.bf16.mxu0 %v2674_v37  ;;  %v2734_v20 = vld [vmem:[#allocation5 + $0x464] ss:$16 sps:$4 sm:$0xff]   ;;  %v2732_v22 = vld [vmem:[#allocation5 + $0x460] ss:$16 sps:$4 sm:$0xff]   ;;  %v2753_v37 = vld [vmem:[#allocation5 + $0xc8] ss:$16 sps:$4 sm:$0xff]  }
  0x8f   : > { %v2740_v24 = vld [vmem:[#allocation5 + $0x484] ss:$16 sps:$4 sm:$0xff]   ;;  %v2738_v26 = vld [vmem:[#allocation5 + $0x480] ss:$16 sps:$4 sm:$0xff]  }
  0x90   : > { %1433 = vmatpush1.bf16.msra.mxu1 %v2676_v38  ;;  %v2746_v28 = vld [vmem:[#allocation5 + $0x4a4] ss:$16 sps:$4 sm:$0xff]   ;;  %v2744_v32 = vld [vmem:[#allocation5 + $0x4a0] ss:$16 sps:$4 sm:$0xff]  }
  0x91   : > { %1474 = vmatpush1.bf16.msra.mxu0 %v2677_v39  ;;  %1434 = vmatprep.subr.bf16.mxu1 %v2678_v40  ;;  %v2752_v34 = vld [vmem:[#allocation5 + $0x4c4] ss:$16 sps:$4 sm:$0xff]   ;;  %v2750_v36 = vld [vmem:[#allocation5 + $0x4c0] ss:$16 sps:$4 sm:$0xff]   ;;  %v2761_v39 = vld [vmem:[#allocation5 + $0xec] ss:$16 sps:$4 sm:$0xff]  }
  0x92   : > { %1475 = vmatprep.subr.bf16.mxu0 %v2680_v41  ;;  %v2758_v38 = vld [vmem:[#allocation5 + $0x4e4] ss:$16 sps:$4 sm:$0xff]   ;;  %v2756_v40 = vld [vmem:[#allocation5 + $0x4e0] ss:$16 sps:$4 sm:$0xff]   ;;  %v2759_v41 = vld [vmem:[#allocation5 + $0xe8] ss:$16 sps:$4 sm:$0xff]  }
  0x93   : > { %v2770_v46 = vld [vmem:[#allocation5 + $0x524] ss:$16 sps:$4 sm:$0xff]  }
  0x94   : > { %1435 = vmatpush1.bf16.msra.mxu1 %v2682_v42  ;;  %v2764_v42 = vld [vmem:[#allocation5 + $0x504] ss:$16 sps:$4 sm:$0xff]  }
  0x95   : > { %1476 = vmatpush1.bf16.msra.mxu0 %v2683_v43  ;;  %1436 = vmatprep.subr.bf16.mxu1 %v2684_v44  ;;  %v2767_v43 = vld [vmem:[#allocation5 + $0x10c] ss:$16 sps:$4 sm:$0xff]   ;;  %v2762_v44 = vld [vmem:[#allocation5 + $0x500] ss:$16 sps:$4 sm:$0xff]  }
  0x96   : > { %1477 = vmatprep.subr.bf16.mxu0 %v2686_v45  ;;  %v2765_v45 = vld [vmem:[#allocation5 + $0x108] ss:$16 sps:$4 sm:$0xff]   ;;  %v275_v4 = vld [vmem:[%s3357_s23 + $0x20] sm:$0xff]  ;;  %s3080_s23 = scalar_lea.vmem %s3079_s17, 512 }
  0x97   : > { %v2897_v29 = vld [vmem:[#allocation7 + $0x14] ss:$8 sps:$4 sm:$0xff]   ;;  %p3082_p9 = scmp.lt.s32.totalorder %s3080_s23, %s3074_s28 }
  0x98   : > { %1437 = vmatpush1.bf16.msra.mxu1 %v2688_v47  ;;  %v2773_v47 = vld [vmem:[#allocation5 + $0x12c] ss:$16 sps:$4 sm:$0xff]  }
  0x99   : > { %1478 = vmatpush1.bf16.msra.mxu0 %v2689_v50  ;;  %1438 = vmatprep.subr.bf16.mxu1 %v2690_v51  ;;  %v2776_v50 = vld [vmem:[#allocation5 + $0x544] ss:$16 sps:$4 sm:$0xff]   ;;  %v2779_v51 = vld [vmem:[#allocation5 + $0x14c] ss:$16 sps:$4 sm:$0xff]   ;;  %p3083_p12 = por %p3082_p9, %p3081_p5 }
  0x9a   : > { %1479 = vmatprep.subr.bf16.mxu0 %v2692_v53  ;;  %v2774_v53 = vld [vmem:[#allocation5 + $0x540] ss:$16 sps:$4 sm:$0xff]  }
  0x9b   : > { %p3084_p2 = pnand %p3083_p12, %p3077_p3 }
  0x9c   : > { %1439 = vmatpush1.bf16.msra.mxu1 %v2694_v54  ;;  %v2777_v54 = vld [vmem:[#allocation5 + $0x148] ss:$16 sps:$4 sm:$0xff]  }
  0x9d   : > { %1480 = vmatpush1.bf16.msra.mxu0 %v2695_v55  ;;  %1440 = vmatprep.subr.bf16.mxu1 %v2696_v56  ;;  %v2782_v55 = vld [vmem:[#allocation5 + $0x564] ss:$16 sps:$4 sm:$0xff]   ;;  %v2785_v56 = vld [vmem:[#allocation5 + $0x16c] ss:$16 sps:$4 sm:$0xff]  }
  0x9e   : > { %1481 = vmatprep.subr.bf16.mxu0 %v2698_v57  ;;  %v2780_v57 = vld [vmem:[#allocation5 + $0x560] ss:$16 sps:$4 sm:$0xff]  }
  0xa0   : > { %1441 = vmatpush1.bf16.msra.mxu1 %v2700_v58  ;;  %v2783_v58 = vld [vmem:[#allocation5 + $0x168] ss:$16 sps:$4 sm:$0xff]  }
  0xa1   : > { %1482 = vmatpush1.bf16.msra.mxu0 %v2701_v59  ;;  %1442 = vmatprep.subr.bf16.mxu1 %v2702_v60  ;;  %v2788_v59 = vld [vmem:[#allocation5 + $0x584] ss:$16 sps:$4 sm:$0xff]   ;;  %v2791_v60 = vld [vmem:[#allocation5 + $0x18c] ss:$16 sps:$4 sm:$0xff]  }
  0xa2   : > { %1483 = vmatprep.subr.bf16.mxu0 %v2704_v61  ;;  %v463_v61 = vld [vmem:[#allocation5 + $0x5a0] sm:$0xff] }
  0xa4   : > { %1443 = vmatpush1.bf16.msra.mxu1 %v2706_v62  ;;  %v2786_v62 = vld [vmem:[#allocation5 + $0x580] ss:$16 sps:$4 sm:$0xff]  }
  0xa5   : > { %1484 = vmatpush1.bf16.msra.mxu0 %v2707_v63  ;;  %1444 = vmatprep.subr.bf16.mxu1 %v2708_v0  ;;  %v2789_v63 = vld [vmem:[#allocation5 + $0x188] ss:$16 sps:$4 sm:$0xff]   ;;  %v2443_v0 = vcombine.high %v463_v61, %v463_v61 }
  0xa6   : > { %1485 = vmatprep.subr.bf16.mxu0 %v2710_v1  ;;  %v2795_v1 = vld [vmem:[#allocation5 + $0x1ac] ss:$16 sps:$4 sm:$0xff]  }
  0xa8   : > { %1445 = vmatpush1.bf16.msra.mxu1 %v2712_v2  ;;  %v2442_v2 = vcombine.low %v463_v61, %v463_v61  ;;  %v2845_v61 = vld [vmem:[#allocation5 + $0x3c8] ss:$16 sps:$4 sm:$0xff]  }
  0xa9   : > { %1486 = vmatpush1.bf16.msra.mxu0 %v2713_v3  ;;  %1537 = vmatprep.subr.bf16.mxu1 %v2719_v7  ;;  %v2793_v3 = vld [vmem:[#allocation5 + $0x1a8] ss:$16 sps:$4 sm:$0xff]   ;;  %v3392_v7 = vpack.c.bf16 %v275_v4, %v275_v4  ;;  %v2927_v4 = vld [vmem:[#allocation7 + $0xb4] ss:$8 sps:$4 sm:$0xff]  }
  0xaa   : > { %1496 = vmatprep.subr.bf16.mxu0 %v2716_v5  ;;  %v1403_v5 = vsel %vm1401_vm1, %v2442_v2, 0  ;;  %v2922_v2 = vld [vmem:[#allocation7 + $0xa0] ss:$8 sps:$4 sm:$0xff]  }
  0xab   : > { %1447 = vmatmul.mubr.bf16.vlgmr.msra.gmra.mrb[0].mxu1 %v3377_v8 }
  0xac   : > { %1488 = vmatmul.mubr.bf16.vlgmr.msra.gmra.mrb[0].mxu0 %v3379_v11  ;;  %1538 = vmatpush1.bf16.msra.mxu1 %v2717_v10  ;;  %v2802_v10 = vld [vmem:[#allocation5 + $0x1ec] ss:$16 sps:$4 sm:$0xff]  }
  0xad   : > { %1497 = vmatpush1.bf16.msra.mxu0 %v2714_v9  ;;  %1539 = vmatprep.subr.bf16.mxu1 %v2725_v13  ;;  %v2797_v9 = vld [vmem:[#allocation5 + $0x1c8] ss:$16 sps:$4 sm:$0xff]   ;;  %v2805_v13 = vld [vmem:[#allocation5 + $0x20c] ss:$16 sps:$4 sm:$0xff]  }
  0xae   : > { %1498 = vmatprep.subr.bf16.mxu0 %v2722_v12  ;;  %1569 = vmatprep.mubr.bf16.mxu1 %v3368_v48  ;;  %v2768_v48 = vld [vmem:[#allocation5 + $0x520] ss:$16 sps:$4 sm:$0xff]   ;;  %v2800_v12 = vld [vmem:[#allocation5 + $0x1e8] ss:$16 sps:$4 sm:$0xff]  }
  0xaf   : > { %2447 = vmatprep.mubr.msk.bf16.mxu0 %vm1397_vm0, %v3385_v31 }
  0xb0   : > { %1540 = vmatpush1.bf16.msra.mxu1 %v2723_v15  ;;  %v2808_v15 = vld [vmem:[#allocation5 + $0x22c] ss:$16 sps:$4 sm:$0xff]  }
  0xb1   : > { %1499 = vmatpush1.bf16.msra.mxu0 %v2720_v14  ;;  %1541 = vmatprep.subr.bf16.mxu1 %v2731_v17  ;;  %v2803_v14 = vld [vmem:[#allocation5 + $0x208] ss:$16 sps:$4 sm:$0xff]   ;;  %v2811_v17 = vld [vmem:[#allocation5 + $0x24c] ss:$16 sps:$4 sm:$0xff]  }
  0xb2   : > { %1500 = vmatprep.subr.bf16.mxu0 %v2728_v16  ;;  %v2806_v16 = vld [vmem:[#allocation5 + $0x228] ss:$16 sps:$4 sm:$0xff]  }
  0xb4   : > { %1542 = vmatpush1.bf16.msra.mxu1 %v2729_v19  ;;  %v2814_v19 = vld [vmem:[#allocation5 + $0x26c] ss:$16 sps:$4 sm:$0xff]  }
  0xb5   : > { %1501 = vmatpush1.bf16.msra.mxu0 %v2726_v18  ;;  %1543 = vmatprep.subr.bf16.mxu1 %v2737_v21  ;;  %v2809_v18 = vld [vmem:[#allocation5 + $0x248] ss:$16 sps:$4 sm:$0xff]   ;;  %v2817_v21 = vld [vmem:[#allocation5 + $0x28c] ss:$16 sps:$4 sm:$0xff]  }
  0xb6   : > { %1502 = vmatprep.subr.bf16.mxu0 %v2734_v20  ;;  %v2812_v20 = vld [vmem:[#allocation5 + $0x268] ss:$16 sps:$4 sm:$0xff]  }
  0xb8   : > { %1544 = vmatpush1.bf16.msra.mxu1 %v2735_v23  ;;  %v2820_v23 = vld [vmem:[#allocation5 + $0x2ac] ss:$16 sps:$4 sm:$0xff]  }
  0xb9   : > { %1503 = vmatpush1.bf16.msra.mxu0 %v2732_v22  ;;  %1545 = vmatprep.subr.bf16.mxu1 %v2743_v25  ;;  %v2815_v22 = vld [vmem:[#allocation5 + $0x288] ss:$16 sps:$4 sm:$0xff]   ;;  %v2894_v25 = vld [vmem:[#allocation7 + $0x4] ss:$8 sps:$4 sm:$0xff]  }
  0xba   : > { %1504 = vmatprep.subr.bf16.mxu0 %v2740_v24  ;;  %v2818_v24 = vld [vmem:[#allocation5 + $0x2a8] ss:$16 sps:$4 sm:$0xff]  }
  0xbc   : > { %1546 = vmatpush1.bf16.msra.mxu1 %v2741_v27  ;;  %v2826_v27 = vld [vmem:[#allocation5 + $0x2ec] ss:$16 sps:$4 sm:$0xff]  }
  0xbd   : > { %1505 = vmatpush1.bf16.msra.mxu0 %v2738_v26  ;;  %1547 = vmatprep.subr.bf16.mxu1 %v2749_v30  ;;  %v2892_v26 = vld [vmem:[#allocation7] ss:$8 sps:$4 sm:$0xff]   ;;  %v2900_v30 = vld [vmem:[#allocation7 + $0x24] ss:$8 sps:$4 sm:$0xff]  }
  0xbe   : > { %1506 = vmatprep.subr.bf16.mxu0 %v2746_v28  ;;  %v2895_v28 = vld [vmem:[#allocation7 + $0x10] ss:$8 sps:$4 sm:$0xff]  }
  0xc0   : > { %1548 = vmatpush1.bf16.msra.mxu1 %v2747_v33  ;;  %v2898_v33 = vld [vmem:[#allocation7 + $0x20] ss:$8 sps:$4 sm:$0xff]  }
  0xc1   : > { %1507 = vmatpush1.bf16.msra.mxu0 %v2744_v32  ;;  %1549 = vmatprep.subr.bf16.mxu1 %v2755_v35  ;;  %v2824_v32 = vld [vmem:[#allocation5 + $0x2e8] ss:$16 sps:$4 sm:$0xff]   ;;  %v2903_v35 = vld [vmem:[#allocation7 + $0x34] ss:$8 sps:$4 sm:$0xff]  }
  0xc2   : > { %1508 = vmatprep.subr.bf16.mxu0 %v2752_v34  ;;  %v2829_v34 = vld [vmem:[#allocation5 + $0x30c] ss:$16 sps:$4 sm:$0xff]  }
  0xc4   : > { %1550 = vmatpush1.bf16.msra.mxu1 %v2753_v37  ;;  %v2901_v37 = vld [vmem:[#allocation7 + $0x30] ss:$8 sps:$4 sm:$0xff]  }
  0xc5   : > { %1509 = vmatpush1.bf16.msra.mxu0 %v2750_v36  ;;  %1551 = vmatprep.subr.bf16.mxu1 %v2761_v39  ;;  %v2827_v36 = vld [vmem:[#allocation5 + $0x308] ss:$16 sps:$4 sm:$0xff]   ;;  %v2906_v39 = vld [vmem:[#allocation7 + $0x44] ss:$8 sps:$4 sm:$0xff]  }
  0xc6   : > { %1510 = vmatprep.subr.bf16.mxu0 %v2758_v38  ;;  %v2832_v38 = vld [vmem:[#allocation5 + $0x32c] ss:$16 sps:$4 sm:$0xff]  }
  0xc8   : > { %1552 = vmatpush1.bf16.msra.mxu1 %v2759_v41  ;;  %v2904_v41 = vld [vmem:[#allocation7 + $0x40] ss:$8 sps:$4 sm:$0xff]  }
  0xc9   : > { %1511 = vmatpush1.bf16.msra.mxu0 %v2756_v40  ;;  %1553 = vmatprep.subr.bf16.mxu1 %v2767_v43  ;;  %v2830_v40 = vld [vmem:[#allocation5 + $0x328] ss:$16 sps:$4 sm:$0xff]   ;;  %v2909_v43 = vld [vmem:[#allocation7 + $0x54] ss:$8 sps:$4 sm:$0xff]  }
  0xca   : > { %1512 = vmatprep.subr.bf16.mxu0 %v2764_v42  ;;  %v2835_v42 = vld [vmem:[#allocation5 + $0x34c] ss:$16 sps:$4 sm:$0xff]  }
  0xcc   : > { %1554 = vmatpush1.bf16.msra.mxu1 %v2765_v45  ;;  %v2907_v45 = vld [vmem:[#allocation7 + $0x50] ss:$8 sps:$4 sm:$0xff]  }
  0xcd   : > { %1513 = vmatpush1.bf16.msra.mxu0 %v2762_v44  ;;  %1555 = vmatprep.subr.bf16.mxu1 %v2773_v47  ;;  %v2833_v44 = vld [vmem:[#allocation5 + $0x348] ss:$16 sps:$4 sm:$0xff]   ;;  %v2912_v47 = vld [vmem:[#allocation7 + $0x64] ss:$8 sps:$4 sm:$0xff]  }
  0xce   : > { %1514 = vmatprep.subr.bf16.mxu0 %v2770_v46  ;;  %v2838_v46 = vld [vmem:[#allocation5 + $0x36c] ss:$16 sps:$4 sm:$0xff]  }
  0xd0   : > { %1556 = vmatpush1.bf16.msra.mxu1 %v2771_v49  ;;  %v2910_v49 = vld [vmem:[#allocation7 + $0x60] ss:$8 sps:$4 sm:$0xff]  }
  0xd1   : > { %1515 = vmatpush1.bf16.msra.mxu0 %v2768_v48  ;;  %1557 = vmatprep.subr.bf16.mxu1 %v2779_v51  ;;  %v2836_v48 = vld [vmem:[#allocation5 + $0x368] ss:$16 sps:$4 sm:$0xff]   ;;  %v2915_v51 = vld [vmem:[#allocation7 + $0x74] ss:$8 sps:$4 sm:$0xff]  }
  0xd2   : > { %1516 = vmatprep.subr.bf16.mxu0 %v2776_v50  ;;  %v2841_v50 = vld [vmem:[#allocation5 + $0x38c] ss:$16 sps:$4 sm:$0xff]  }
  0xd4   : > { %1558 = vmatpush1.bf16.msra.mxu1 %v2777_v54  ;;  %v2913_v54 = vld [vmem:[#allocation7 + $0x70] ss:$8 sps:$4 sm:$0xff]  }
  0xd5   : > { %1517 = vmatpush1.bf16.msra.mxu0 %v2774_v53  ;;  %1559 = vmatprep.subr.bf16.mxu1 %v2785_v56  ;;  %v2839_v53 = vld [vmem:[#allocation5 + $0x388] ss:$16 sps:$4 sm:$0xff]   ;;  %v2918_v56 = vld [vmem:[#allocation7 + $0x84] ss:$8 sps:$4 sm:$0xff]  }
  0xd6   : > { %1518 = vmatprep.subr.bf16.mxu0 %v2782_v55  ;;  %v2844_v55 = vld [vmem:[#allocation5 + $0x3ac] ss:$16 sps:$4 sm:$0xff]  }
  0xd8   : > { %1560 = vmatpush1.bf16.msra.mxu1 %v2783_v58  ;;  %v2916_v58 = vld [vmem:[#allocation7 + $0x80] ss:$8 sps:$4 sm:$0xff]  }
  0xd9   : > { %1519 = vmatpush1.bf16.msra.mxu0 %v2780_v57  ;;  %1561 = vmatprep.subr.bf16.mxu1 %v2791_v60  ;;  %v2842_v57 = vld [vmem:[#allocation5 + $0x3a8] ss:$16 sps:$4 sm:$0xff]   ;;  %v2921_v60 = vld [vmem:[#allocation7 + $0x94] ss:$8 sps:$4 sm:$0xff]  }
  0xda   : > { %1520 = vmatprep.subr.bf16.mxu0 %v2788_v59  ;;  %v2847_v59 = vld [vmem:[#allocation5 + $0x3cc] ss:$16 sps:$4 sm:$0xff]  }
  0xdc   : > { %1562 = vmatpush1.bf16.msra.mxu1 %v2789_v63  ;;  %v2850_v63 = vld [vmem:[#allocation5 + $0x3ec] ss:$16 sps:$4 sm:$0xff]  }
  0xdd   : > { %1521 = vmatpush1.bf16.msra.mxu0 %v2786_v62  ;;  %1563 = vmatprep.subr.bf16.mxu1 %v2795_v1  ;;  %v2919_v62 = vld [vmem:[#allocation7 + $0x90] ss:$8 sps:$4 sm:$0xff]  }
  0xde   : > { %2446 = vmatprep.subr.msk.bf16.mxu0 %vm1401_vm1, %v2443_v0  ;;  %v2924_v0 = vld [vmem:[#allocation7 + $0xa4] ss:$8 sps:$4 sm:$0xff]   ;;  %v2848_v1 = vld [vmem:[#allocation5 + $0x3e8] ss:$16 sps:$4 sm:$0xff]  }
  0xe0   : > { %1564 = vmatpush1.bf16.msra.mxu1 %v2793_v3  ;;  %v2853_v3 = vld [vmem:[#allocation5 + $0x40c] ss:$16 sps:$4 sm:$0xff]  }
  0xe1   : > { %1523 = vmatpush1.bf16.msra.mxu0 %v1403_v5  ;;  %1565 = vmatprep.subr.bf16.mxu1 %v2799_v6  ;;  %v2851_v5 = vld [vmem:[#allocation5 + $0x408] ss:$16 sps:$4 sm:$0xff]   ;;  %v2856_v6 = vld [vmem:[#allocation5 + $0x42c] ss:$16 sps:$4 sm:$0xff]  }
  0xe2   : > { %2064 = vmatprep.subr.bf16.mxu0 %v2894_v25  ;;  %v2871_v25 = vld [vmem:[#allocation5 + $0x4cc] ss:$16 sps:$4 sm:$0xff]  }
  0xe4   : > { %1529 = vmatmul.mubr.bf16.vlgmr.msra.gmra.mrb[0].mxu0 %v3392_v7  ;;  %1566 = vmatpush1.bf16.msra.mxu1 %v2797_v9  ;;  %v2925_v9 = vld [vmem:[#allocation7 + $0xb0] ss:$8 sps:$4 sm:$0xff]  }
  0xe5   : > { %1567 = vmatprep.subr.bf16.mxu1 %v2802_v10  ;;  %2065 = vmatpush1.bf16.msra.mxu0 %v2892_v26  ;;  %v2930_v10 = vld [vmem:[#allocation7 + $0xc4] ss:$8 sps:$4 sm:$0xff]  }
  0xe6   : > { %2066 = vmatprep.subr.bf16.mxu0 %v2897_v29  ;;  %v2942_v26 = vld [vmem:[#allocation7 + $0x104] ss:$8 sps:$4 sm:$0xff]  }
  0xe7   : > { %v2877_v29 = vld [vmem:[#allocation5 + $0x50c] ss:$16 sps:$4 sm:$0xff]  }
  0xe8   : > { %1568 = vmatpush1.bf16.msra.mxu1 %v2800_v12  ;;  %v2854_v12 = vld [vmem:[#allocation5 + $0x428] ss:$16 sps:$4 sm:$0xff]  }
  0xe9   : > { %1578 = vmatprep.subr.bf16.mxu1 %v2805_v13  ;;  %2067 = vmatpush1.bf16.msra.mxu0 %v2895_v28  ;;  %v2859_v13 = vld [vmem:[#allocation5 + $0x44c] ss:$16 sps:$4 sm:$0xff]   ;;  %v2872_v28 = vld [vmem:[#allocation5 + $0x4e8] ss:$16 sps:$4 sm:$0xff]  }
  0xea   : > { %2068 = vmatprep.subr.bf16.mxu0 %v2900_v30  ;;  %v2875_v30 = vld [vmem:[#allocation5 + $0x508] ss:$16 sps:$4 sm:$0xff]  }
  0xeb   : > { %1570 = vmatmul.mubr.bf16.vlgmr.msra.gmra.mrb[4].mxu1 %v3377_v8  ;;  %v2823_v8 = vld [vmem:[#allocation5 + $0x2cc] ss:$16 sps:$4 sm:$0xff]  }
  0xec   : > { %1579 = vmatpush1.bf16.msra.mxu1 %v2803_v14  ;;  %1610 = vmatprep.mubr.bf16.mxu1 %v3371_v52  ;;  %v2821_v52 = vld [vmem:[#allocation5 + $0x2c8] ss:$16 sps:$4 sm:$0xff]  }
  0xed   : > { %1580 = vmatprep.subr.bf16.mxu1 %v2808_v15  ;;  %2069 = vmatpush1.bf16.msra.mxu0 %v2898_v33  ;;  %v2928_v14 = vld [vmem:[#allocation7 + $0xc0] ss:$8 sps:$4 sm:$0xff]   ;;  %v2933_v15 = vld [vmem:[#allocation7 + $0xd4] ss:$8 sps:$4 sm:$0xff]  }
  0xee   : > { %2070 = vmatprep.subr.bf16.mxu0 %v2903_v35  ;;  %v2878_v33 = vld [vmem:[#allocation5 + $0x528] ss:$16 sps:$4 sm:$0xff]  }
  0xef   : > { %v2881_v35 = vld [vmem:[#allocation5 + $0x548] ss:$16 sps:$4 sm:$0xff]  }
  0xf0   : > { %1581 = vmatpush1.bf16.msra.mxu1 %v2806_v16  ;;  %v2857_v16 = vld [vmem:[#allocation5 + $0x448] ss:$16 sps:$4 sm:$0xff]  }
  0xf1   : > { %1582 = vmatprep.subr.bf16.mxu1 %v2811_v17  ;;  %2071 = vmatpush1.bf16.msra.mxu0 %v2901_v37  ;;  %v2862_v17 = vld [vmem:[#allocation5 + $0x46c] ss:$16 sps:$4 sm:$0xff]   ;;  %v2884_v37 = vld [vmem:[#allocation5 + $0x568] ss:$16 sps:$4 sm:$0xff]  }
  0xf2   : > { %2072 = vmatprep.subr.bf16.mxu0 %v2906_v39  ;;  %v464_v39 = vld [vmem:[#allocation5 + $0x5a8] sm:$0xff] }
  0xf4   : > { %1583 = vmatpush1.bf16.msra.mxu1 %v2809_v18  ;;  %v2931_v18 = vld [vmem:[#allocation7 + $0xd0] ss:$8 sps:$4 sm:$0xff]  }
  0xf5   : > { %1584 = vmatprep.subr.bf16.mxu1 %v2814_v19  ;;  %2073 = vmatpush1.bf16.msra.mxu0 %v2904_v41  ;;  %v2865_v19 = vld [vmem:[#allocation5 + $0x48c] ss:$16 sps:$4 sm:$0xff]   ;;  %v2445_v41 = vcombine.high %v464_v39, %v464_v39 }
  0xf6   : > { %2074 = vmatprep.subr.bf16.mxu0 %v2909_v43 }
  0xf8   : > { %1585 = vmatpush1.bf16.msra.mxu1 %v2812_v20  ;;  %v2936_v20 = vld [vmem:[#allocation7 + $0xe4] ss:$8 sps:$4 sm:$0xff]  }
  0xf9   : > { %1586 = vmatprep.subr.bf16.mxu1 %v2817_v21  ;;  %2075 = vmatpush1.bf16.msra.mxu0 %v2907_v45  ;;  %v2863_v21 = vld [vmem:[#allocation5 + $0x488] ss:$16 sps:$4 sm:$0xff]  }
  0xfa   : > { %2076 = vmatprep.subr.bf16.mxu0 %v2912_v47 }
  0xfc   : > { %1587 = vmatpush1.bf16.msra.mxu1 %v2815_v22  ;;  %v2868_v22 = vld [vmem:[#allocation5 + $0x4ac] ss:$16 sps:$4 sm:$0xff]  }
  0xfd   : > { %1588 = vmatprep.subr.bf16.mxu1 %v2820_v23  ;;  %2077 = vmatpush1.bf16.msra.mxu0 %v2910_v49  ;;  %v2939_v23 = vld [vmem:[#allocation7 + $0xf4] ss:$8 sps:$4 sm:$0xff]  }
  0xfe   : > { %2078 = vmatprep.subr.bf16.mxu0 %v2915_v51  ;;  %v3409_v51 = vld [vmem:[%s3480_s2] sm:$0xf] }
 0x100   : > { %1589 = vmatpush1.bf16.msra.mxu1 %v2818_v24  ;;  %v2937_v24 = vld [vmem:[#allocation7 + $0xf0] ss:$8 sps:$4 sm:$0xff]  }
 0x101   : > { %1590 = vmatprep.subr.bf16.mxu1 %v2823_v8  ;;  %2079 = vmatpush1.bf16.msra.mxu0 %v2913_v54  ;;  %v2866_v8 = vld [vmem:[#allocation5 + $0x4a8] ss:$16 sps:$4 sm:$0xff]  }
 0x102   : > { %2080 = vmatprep.subr.bf16.mxu0 %v2918_v56 }
 0x104   : > { %1591 = vmatpush1.bf16.msra.mxu1 %v2821_v52  ;;  %v2869_v52 = vld [vmem:[#allocation5 + $0x4c8] ss:$16 sps:$4 sm:$0xff]  }
 0x105   : > { %1592 = vmatprep.subr.bf16.mxu1 %v2826_v27  ;;  %2081 = vmatpush1.bf16.msra.mxu0 %v2916_v58  ;;  %v2874_v27 = vld [vmem:[#allocation5 + $0x4ec] ss:$16 sps:$4 sm:$0xff]  }
 0x106   : > { %2082 = vmatprep.subr.bf16.mxu0 %v2921_v60 }
 0x108   : > { %1593 = vmatpush1.bf16.msra.mxu1 %v2824_v32  ;;  %v2880_v32 = vld [vmem:[#allocation5 + $0x52c] ss:$16 sps:$4 sm:$0xff]  }
 0x109   : > { %1594 = vmatprep.subr.bf16.mxu1 %v2829_v34  ;;  %2083 = vmatpush1.bf16.msra.mxu0 %v2919_v62  ;;  %v2883_v34 = vld [vmem:[#allocation5 + $0x54c] ss:$16 sps:$4 sm:$0xff]  }
 0x10a   : > { %2084 = vmatprep.subr.bf16.mxu0 %v2924_v0 }
 0x10c   : > { %1595 = vmatpush1.bf16.msra.mxu1 %v2827_v36  ;;  %v2886_v36 = vld [vmem:[#allocation5 + $0x56c] ss:$16 sps:$4 sm:$0xff]  }
 0x10d   : > { %1596 = vmatprep.subr.bf16.mxu1 %v2832_v38  ;;  %2085 = vmatpush1.bf16.msra.mxu0 %v2922_v2  ;;  %v2889_v38 = vld [vmem:[#allocation5 + $0x58c] ss:$16 sps:$4 sm:$0xff]   ;;  %v2940_v2 = vld [vmem:[#allocation7 + $0x100] ss:$8 sps:$4 sm:$0xff]  }
 0x10e   : > { %2086 = vmatprep.subr.bf16.mxu0 %v2927_v4  ;;  %v2945_v4 = vld [vmem:[#allocation7 + $0x114] ss:$8 sps:$4 sm:$0xff]  }
 0x110   : > { %1597 = vmatpush1.bf16.msra.mxu1 %v2830_v40  ;;  %v2887_v40 = vld [vmem:[#allocation5 + $0x588] ss:$16 sps:$4 sm:$0xff]  }
 0x111   : > { %1598 = vmatprep.subr.bf16.mxu1 %v2835_v42  ;;  %2087 = vmatpush1.bf16.msra.mxu0 %v2925_v9  ;;  %v2444_v42 = vcombine.low %v464_v39, %v464_v39  ;;  %v2946_v9 = vld [vmem:[#allocation7 + $0x120] ss:$8 sps:$4 sm:$0xff]  }
 0x112   : > { %2088 = vmatprep.subr.bf16.mxu0 %v2930_v10  ;;  %v2951_v10 = vld [vmem:[#allocation7 + $0x134] ss:$8 sps:$4 sm:$0xff]  }
 0x113   : > { %v1409_v43 = vsel %vm1401_vm1, %v2444_v42, 0 }
 0x114   : > { %1599 = vmatpush1.bf16.msra.mxu1 %v2833_v44 }
 0x115   : > { %1600 = vmatprep.subr.bf16.mxu1 %v2838_v46  ;;  %2089 = vmatpush1.bf16.msra.mxu0 %v2928_v14  ;;  %v2952_v14 = vld [vmem:[#allocation7 + $0x140] ss:$8 sps:$4 sm:$0xff]  }
 0x116   : > { %2090 = vmatprep.subr.bf16.mxu0 %v2933_v15  ;;  %v2957_v15 = vld [vmem:[#allocation7 + $0x154] ss:$8 sps:$4 sm:$0xff]  }
 0x118   : > { %1601 = vmatpush1.bf16.msra.mxu1 %v2836_v48  ;;  %v467_v48 = vlaneseq }
 0x119   : > { %1602 = vmatprep.subr.bf16.mxu1 %v2841_v50  ;;  %2091 = vmatpush1.bf16.msra.mxu0 %v2931_v18  ;;  %v2958_v18 = vld [vmem:[#allocation7 + $0x160] ss:$8 sps:$4 sm:$0xff]  }
 0x11a   : > { %2092 = vmatprep.subr.bf16.mxu0 %v2936_v20  ;;  %v3403_v49 = vshrl.u32 %v467_v48, 7  ;;  %v2966_v20 = vld [vmem:[#allocation7 + $0x184] ss:$8 sps:$4 sm:$0xff]   ;;  %v1732_v48 = vld [vmem:[%s3482_s4] sm:$0x3] }
 0x11c   : > { %1603 = vmatpush1.bf16.msra.mxu1 %v2839_v53  ;;  %v469_v50 = vsub.s32 0, %v3403_v49  ;;  %v473_v53 = vsub.s32 1, %v3403_v49 }
 0x11d   : > { %1604 = vmatprep.subr.bf16.mxu1 %v2844_v55 }
 0x11e   : > { %v474_v54 = vrot.slane %v3409_v51, %v473_v53 }
 0x120   : > { %1605 = vmatpush1.bf16.msra.mxu1 %v2842_v57 }
 0x121   : > { %1606 = vmatprep.subr.bf16.mxu1 %v2847_v59 }
 0x124   : > { %1607 = vmatpush1.bf16.msra.mxu1 %v2845_v61 }
 0x125   : > { %1608 = vmatprep.subr.bf16.mxu1 %v2850_v63 }
 0x128   : > { %1609 = vmatpush1.bf16.msra.mxu1 %v2848_v1 }
 0x129   : > { %1619 = vmatprep.subr.bf16.mxu1 %v2853_v3 }
 0x12b   : > { %1611 = vmatmul.mubr.bf16.vlgmr.msra.gmra.mrb[4].mxu1 %v3379_v11  ;;  %v2860_v11 = vld [vmem:[#allocation5 + $0x468] ss:$16 sps:$4 sm:$0xff]  }
 0x12c   : > { %1620 = vmatpush1.bf16.msra.mxu1 %v2851_v5  ;;  %2449 = vmatprep.mubr.msk.bf16.mxu1 %vm1397_vm0, %v3385_v31  ;;  %v2934_v31 = vld [vmem:[#allocation7 + $0xe0] ss:$8 sps:$4 sm:$0xff]   ;;  %v2943_v5 = vld [vmem:[#allocation7 + $0x110] ss:$8 sps:$4 sm:$0xff]  }
 0x12d   : > { %1621 = vmatprep.subr.bf16.mxu1 %v2856_v6  ;;  %2093 = vmatpush1.bf16.msra.mxu0 %v2934_v31  ;;  %v2948_v6 = vld [vmem:[#allocation7 + $0x124] ss:$8 sps:$4 sm:$0xff]   ;;  %v2964_v31 = vld [vmem:[#allocation7 + $0x180] ss:$8 sps:$4 sm:$0xff]  }
 0x12e   : > { %2094 = vmatprep.subr.bf16.mxu0 %v2939_v23  ;;  %v2972_v23 = vld [vmem:[#allocation7 + $0x1a4] ss:$8 sps:$4 sm:$0xff]  }
 0x130   : > { %1622 = vmatpush1.bf16.msra.mxu1 %v2854_v12  ;;  %v2949_v12 = vld [vmem:[#allocation7 + $0x130] ss:$8 sps:$4 sm:$0xff]  }
 0x131   : > { %1623 = vmatprep.subr.bf16.mxu1 %v2859_v13  ;;  %2095 = vmatpush1.bf16.msra.mxu0 %v2937_v24  ;;  %v2954_v13 = vld [vmem:[#allocation7 + $0x144] ss:$8 sps:$4 sm:$0xff]   ;;  %v2970_v24 = vld [vmem:[#allocation7 + $0x1a0] ss:$8 sps:$4 sm:$0xff]  }
 0x132   : > { %2105 = vmatprep.subr.bf16.mxu0 %v2942_v26  ;;  %v2978_v26 = vld [vmem:[#allocation7 + $0x1c4] ss:$8 sps:$4 sm:$0xff]  }
 0x134   : > { %1624 = vmatpush1.bf16.msra.mxu1 %v2857_v16  ;;  %v2955_v16 = vld [vmem:[#allocation7 + $0x150] ss:$8 sps:$4 sm:$0xff]  }
 0x135   : > { %1625 = vmatprep.subr.bf16.mxu1 %v2862_v17  ;;  %v2960_v17 = vld [vmem:[#allocation7 + $0x164] ss:$8 sps:$4 sm:$0xff]  }
 0x138   : > { %1626 = vmatpush1.bf16.msra.mxu1 %v2860_v11  ;;  %v2963_v11 = vld [vmem:[#allocation7 + $0x174] ss:$8 sps:$4 sm:$0xff]  }
 0x139   : > { %1627 = vmatprep.subr.bf16.mxu1 %v2865_v19  ;;  %v2961_v19 = vld [vmem:[#allocation7 + $0x170] ss:$8 sps:$4 sm:$0xff]  }
 0x13c   : > { %1628 = vmatpush1.bf16.msra.mxu1 %v2863_v21  ;;  %v2969_v21 = vld [vmem:[#allocation7 + $0x194] ss:$8 sps:$4 sm:$0xff]  }
 0x13d   : > { %1629 = vmatprep.subr.bf16.mxu1 %v2868_v22  ;;  %v2967_v22 = vld [vmem:[#allocation7 + $0x190] ss:$8 sps:$4 sm:$0xff]  }
 0x140   : > { %1630 = vmatpush1.bf16.msra.mxu1 %v2866_v8  ;;  %v2975_v8 = vld [vmem:[#allocation7 + $0x1b4] ss:$8 sps:$4 sm:$0xff]  }
 0x141   : > { %1631 = vmatprep.subr.bf16.mxu1 %v2871_v25  ;;  %v2973_v25 = vld [vmem:[#allocation7 + $0x1b0] ss:$8 sps:$4 sm:$0xff]  }
 0x144   : > { %1632 = vmatpush1.bf16.msra.mxu1 %v2869_v52  ;;  %v2976_v52 = vld [vmem:[#allocation7 + $0x1c0] ss:$8 sps:$4 sm:$0xff]  }
 0x145   : > { %1633 = vmatprep.subr.bf16.mxu1 %v2874_v27  ;;  %v2981_v27 = vld [vmem:[#allocation7 + $0x1d4] ss:$8 sps:$4 sm:$0xff]  }
 0x148   : > { %1634 = vmatpush1.bf16.msra.mxu1 %v2872_v28  ;;  %v2979_v28 = vld [vmem:[#allocation7 + $0x1d0] ss:$8 sps:$4 sm:$0xff]  }
 0x149   : > { %1635 = vmatprep.subr.bf16.mxu1 %v2877_v29  ;;  %v2984_v29 = vld [vmem:[#allocation7 + $0x1e4] ss:$8 sps:$4 sm:$0xff]  }
 0x14c   : > { %1636 = vmatpush1.bf16.msra.mxu1 %v2875_v30  ;;  %v2982_v30 = vld [vmem:[#allocation7 + $0x1e0] ss:$8 sps:$4 sm:$0xff]  }
 0x14d   : > { %1637 = vmatprep.subr.bf16.mxu1 %v2880_v32  ;;  %v2987_v32 = vld [vmem:[#allocation7 + $0x1f4] ss:$8 sps:$4 sm:$0xff]  }
 0x150   : > { %1638 = vmatpush1.bf16.msra.mxu1 %v2878_v33  ;;  %v2985_v33 = vld [vmem:[#allocation7 + $0x1f0] ss:$8 sps:$4 sm:$0xff]  }
 0x151   : > { %1639 = vmatprep.subr.bf16.mxu1 %v2883_v34  ;;  %v477_v34 = vsub.s32 2, %v3403_v49 }
 0x154   : > { %1640 = vmatpush1.bf16.msra.mxu1 %v2881_v35  ;;  %v481_v35 = vsub.s32 3, %v3403_v49 }
 0x155   : > { %1641 = vmatprep.subr.bf16.mxu1 %v2886_v36  ;;  %v478_v36 = vrot.slane %v3409_v51, %v477_v34 }
 0x158   : > { %1642 = vmatpush1.bf16.msra.mxu1 %v2884_v37  ;;  %v482_v37 = vrot.slane %v3409_v51, %v481_v35 }
 0x159   : > { %1643 = vmatprep.subr.bf16.mxu1 %v2889_v38 }
 0x15c   : > { %1644 = vmatpush1.bf16.msra.mxu1 %v2887_v40 }
 0x15d   : > { %2448 = vmatprep.subr.msk.bf16.mxu1 %vm1401_vm1, %v2445_v41 }
 0x160   : > { %1646 = vmatpush1.bf16.msra.mxu1 %v1409_v43 }
 0x163   : > { %1652 = vmatmul.mubr.bf16.vlgmr.msra.gmra.mrb[4].mxu1 %v3392_v7  ;;  %v470_v7 = vrot.slane %v3409_v51, %v469_v50  ;;  %v1737_v51 = vrot.slane %v1732_v48, %v469_v50 }
 0x17e   : > { %v1448_v44 = vpop.f32.mrb[0].mxu1 }
 0x17f   : > { %v1450_v45 = vpop.f32.mrb[1].mxu1  ;;  %v1449_v55 = vadd.f32 %v1448_v44, %v470_v7  ;;  %v1741_v7 = vrot.slane %v1732_v48, %v473_v53 }
 0x180   : > { %v1452_v46 = vpop.f32.mrb[2].mxu1  ;;  %v1451_v56 = vadd.f32 %v1450_v45, %v474_v54 }
 0x181   : > { %v1453_v47 = vpop.f32.mrb[3].mxu1 }
 0x1b7   : > { %v1530_v57 = vpop.f32.mrb[0].mxu0 }
 0x1b8   : > { %v2521_v58 = vadd.f32 %v1530_v57, %v1449_v55  ;;  %v1532_v59 = vpop.f32.mrb[1].mxu0 }
 0x1b9   : > { %v2523_v60 = vadd.f32 %v1532_v59, %v1451_v56  ;;  %v1534_v61 = vpop.f32.mrb[2].mxu0 }
 0x1ba   : > { %v1660_v62 = vmax.f32 %v2521_v58, 0.0  ;;  %v1535_v63 = vpop.f32.mrb[3].mxu0 }
 0x1bb   : > { %v1661_v0 = vmax.f32 %v2523_v60, 0.0 }
 0x1bc   : > { %v1664_v3 = vpack.c.bf16 %v1660_v62, %v1660_v62 }
 0x1bd   : > { %v1665_v1 = vpack.c.bf16 %v1661_v0, %v1661_v0 }
 0x1bf   : > { %2096 = vmatprep.mubr.bf16.mxu0 %v1665_v1 }
 0x1c0   : > { %2097 = vmatmul.mubr.bf16.vlgmr.msra.gmra.mrb[4].mxu0 %v1664_v3 }
 0x1c1   : > { %2106 = vmatpush1.bf16.msra.mxu0 %v2940_v2 }
 0x1c2   : > { %2107 = vmatprep.subr.bf16.mxu0 %v2945_v4 }
 0x1c5   : > { %2108 = vmatpush1.bf16.msra.mxu0 %v2943_v5 }
 0x1c6   : > { %2109 = vmatprep.subr.bf16.mxu0 %v2948_v6 }
 0x1c9   : > { %2110 = vmatpush1.bf16.msra.mxu0 %v2946_v9 }
 0x1ca   : > { %2111 = vmatprep.subr.bf16.mxu0 %v2951_v10 }
 0x1cd   : > { %2112 = vmatpush1.bf16.msra.mxu0 %v2949_v12 }
 0x1ce   : > { %2113 = vmatprep.subr.bf16.mxu0 %v2954_v13 }
 0x1d1   : > { %2114 = vmatpush1.bf16.msra.mxu0 %v2952_v14 }
 0x1d2   : > { %2115 = vmatprep.subr.bf16.mxu0 %v2957_v15 }
 0x1d5   : > { %2116 = vmatpush1.bf16.msra.mxu0 %v2955_v16 }
 0x1d6   : > { %2117 = vmatprep.subr.bf16.mxu0 %v2960_v17 }
 0x1d9   : > { %2118 = vmatpush1.bf16.msra.mxu0 %v2958_v18 }
 0x1da   : > { %2119 = vmatprep.subr.bf16.mxu0 %v2963_v11 }
 0x1dd   : > { %2120 = vmatpush1.bf16.msra.mxu0 %v2961_v19 }
 0x1de   : > { %2121 = vmatprep.subr.bf16.mxu0 %v2966_v20 }
 0x1e1   : > { %2122 = vmatpush1.bf16.msra.mxu0 %v2964_v31 }
 0x1e2   : > { %2123 = vmatprep.subr.bf16.mxu0 %v2969_v21 }
 0x1e5   : > { %2124 = vmatpush1.bf16.msra.mxu0 %v2967_v22 }
 0x1e6   : > { %2125 = vmatprep.subr.bf16.mxu0 %v2972_v23 }
 0x1e9   : > { %2126 = vmatpush1.bf16.msra.mxu0 %v2970_v24 }
 0x1ea   : > { %2127 = vmatprep.subr.bf16.mxu0 %v2975_v8 }
 0x1ed   : > { %2128 = vmatpush1.bf16.msra.mxu0 %v2973_v25 }
 0x1ee   : > { %2129 = vmatprep.subr.bf16.mxu0 %v2978_v26 }
 0x1f1   : > { %2130 = vmatpush1.bf16.msra.mxu0 %v2976_v52 }
 0x1f2   : > { %2131 = vmatprep.subr.bf16.mxu0 %v2981_v27 }
 0x1f5   : > { %2132 = vmatpush1.bf16.msra.mxu0 %v2979_v28 }
 0x1f6   : > { %2133 = vmatprep.subr.bf16.mxu0 %v2984_v29 }
 0x1f9   : > { %2134 = vmatpush1.bf16.msra.mxu0 %v2982_v30 }
 0x1fa   : > { %2135 = vmatprep.subr.bf16.mxu0 %v2987_v32 }
 0x1fd   : > { %2136 = vmatpush1.bf16.msra.mxu0 %v2985_v33 }
 0x236   : > { %v1653_v38 = vpop.f32.mrb[4].mxu1 }
 0x237   : > { %v2524_v39 = vadd.f32 %v1653_v38, %v478_v36  ;;  %v1655_v40 = vpop.f32.mrb[5].mxu1 }
 0x238   : > { %v2525_v41 = vadd.f32 %v1655_v40, %v482_v37  ;;  %v1657_v42 = vpop.f32.mrb[6].mxu1 }
 0x239   : > { %v1662_v43 = vmax.f32 %v2524_v39, 0.0  ;;  %v1658_v44 = vpop.f32.mrb[7].mxu1 }
 0x23a   : > { %v1663_v45 = vmax.f32 %v2525_v41, 0.0 }
 0x23b   : > { %v1666_v47 = vpack.c.bf16 %v1662_v43, %v1662_v43 }
 0x23c   : > { %v1667_v46 = vpack.c.bf16 %v1663_v45, %v1663_v45 }
 0x23e   : > { %2137 = vmatprep.mubr.bf16.mxu0 %v1667_v46 }
 0x23f   : > { %2138 = vmatmul.mubr.bf16.vlgmr.msra.gmra.mrb[4].mxu0 %v1666_v47 }
 0x312   : > { %v2139_v54 = vpop.f32.mrb[4].mxu0 }
 0x313   : > { %v2526_v55 = vadd.f32 %v2139_v54, %v1737_v51  ;;  %v2141_v56 = vpop.f32.mrb[5].mxu0 }
 0x314   : > { %v2527_v57 = vadd.f32 %v2141_v56, %v1741_v7  ;;  %v2143_v58 = vpop.f32.mrb[6].mxu0 }
 0x315   : > { %2146 = vst [vmem:[%s269_s6] sm:$0xff] %v2526_v55  ;;  %v2144_v49 = vpop.f32.mrb[7].mxu0 }
 0x316   : > { %2147 = vst [vmem:[%s269_s6 + $0x8] sm:$0xff] %v2527_v57 }
 0x317   : > { %3087 = shalt.err (!%p3084_p2)
}
 0x318   : > { %s3088_s14 = scalar_lea.hbm %s3434_s10, 256  ;;  %s3092_s8 = scalar_lea.hbm %s3483_s5, 512 }
 0x319   : > { %p3089_p13 = scmp.ne.s32.totalorder %s3434_s10, %s3088_s14  ;;  %p3093_p4 = scmp.lt.u32.totalorder %s3434_s10, %s3483_s5 }
 0x31a   : > { %p3094_p7 = scmp.lt.u32.totalorder %s3092_s8, %s3088_s14  ;;  %p3096_p11 = scmp.lt.u32.totalorder %s3088_s14, %s3434_s10 }
 0x31b   : > { %p3090_p6 = pnand %p3089_p13, %p3497_p0 }
 0x31c   : > { %p3095_p8 = por %p3094_p7, %p3093_p4 }
 0x31d   : > { %p3091_p10 = pneg %p3090_p6 }
 0x31e   : > { %p3097_p1 = por %p3096_p11, %p3095_p8 }
 0x320   : > { %p3098_p3 = pnand %p3097_p1, %p3091_p10 }
 0x322   : > { %3101 = shalt.err (!%p3098_p3)
}
 0x323   : > { %2557 = dma.vmem_to_hbm [thread:$0]  (%p3497_p0), %s3436_s9, 256, %s3434_s10, %s2149_s22  }
 0x324 PF: > { %s2175_s13 = sand.u32 1, %s3132_s18   ;;  %p3498_p5 = scmp.ne.s32.totalorder %s3488_s25, 0 }
 0x325   : > { %p3499_p9 = scmp.ge.s32.totalorder %s3144_s21, 2  ;;  %s2176_s6 = scalar_lea.sflag [#allocation4], %s2175_s13 }
 0x327   : > { %p2571_p12 = pnand %p3499_p9, %p3498_p5 }
 0x329   : > { %3127 = dma.done.wait (!%p2571_p12), %s2176_s6, 256  }
 0x32a   : > { %3129 = vsyncadd (!%p2571_p12), %s2176_s6, 4294967040  ;;  %p19_p2 = scmp.ge.s32.totalorder %s3294_s16, 4   ;;  %s3500_s18 = smov %s3136_s19 }
 0x32b   : > { %s3501_s19 = smov %s3140_s20  ;;  %s3502_s20 = smov %s3303_s27 }
 0x32c   : > { %s3503_s21 = smov %s3294_s16  ;;  %21 = sbr.rel (!%p19_p2) target bundleno = 6 (0x6), region = 93 }
 0x333   :  { %2181 = vsyncpa [#allocation3], 1 }
 0x334   :  { %2183 = vsyncpa [#allocation3 + $0x1], 1 }
 0x335   :  { %2184 = vsyncpa [#allocation6], 1 }
 0x336   :  { %2185 = vsyncpa [#allocation4], 1 }
 0x337   :  { %2187 = vsyncpa [#allocation4 + $0x1], 1 }

</bundles_post_ra>
